<compile_context>
chip_gen: v5e
topology: v5e:2x2
jax: 0.10.0
libtpu: 0.0.40
codegen_flags: <defaults>
</compile_context>

<pallas_src>
import functools

import jax
import jax.numpy as jnp
from jax.experimental import pallas as pl
from jax.experimental.pallas import tpu as pltpu


# Pred block bytes above which we switch to the gridded path (well under the
# 16 MiB v5e default scoped-VMEM limit, with double-buffering headroom).
_SMALL_PATH_PRED_BYTES = 2 * 1024 * 1024
# Per-tile pred bytes budget for the gridded path.
_TILE_PRED_BYTES = 4 * 1024 * 1024


def _round_up(x, m):
    return ((x + m - 1) // m) * m


# ---------------------------------------------------------------------------
# Kernel bodies
# ---------------------------------------------------------------------------

def _row_nll(pred, tgt, from_logits):
    """Per-row NLL.  pred (T, C) native dtype, tgt (T, 1) int32 -> (T, 1) f32."""
    t, c = pred.shape
    col = jax.lax.broadcasted_iota(jnp.int32, (t, c), 1)
    hit = col == tgt
    # Select in native dtype (bf16 stays packed 16x128); upcast only in the
    # reduction.  where-select avoids the 0 * (-inf) = NaN one-hot hazard.
    picked = jnp.sum(jnp.where(hit, pred, 0),
                     axis=-1, keepdims=True, dtype=jnp.float32)       # (T, 1)
    if from_logits:
        x = pred.astype(jnp.float32)
        row_max = jnp.max(x, axis=-1, keepdims=True)
        lse = row_max + jnp.log(jnp.sum(jnp.exp(x - row_max),
                                        axis=-1, keepdims=True))
        return lse - picked
    return -picked


def _small_nll_kernel(pred_ref, tgt_ref, out_ref, *, inv_n, from_logits):
    nll = _row_nll(pred_ref[...], tgt_ref[...], from_logits)
    out_ref[0, 0] = jnp.sum(nll) * jnp.float32(inv_n)


def _small_nll_mse_kernel(pred_ref, tgt_ref, trans_ref, out_ref, *,
                          inv_n, scaled_alpha, from_logits):
    nll = _row_nll(pred_ref[...], tgt_ref[...], from_logits)
    t = trans_ref[...].astype(jnp.float32)
    out_ref[0, 0] = (jnp.sum(nll) * jnp.float32(inv_n)
                     + jnp.sum(t * t) * jnp.float32(scaled_alpha))


def _tiled_nll_kernel(pred_ref, tgt_ref, out_ref, *, from_logits):
    # Per-tile, per-row partial outputs: no carried accumulator, so the row
    # grid axis is fully "parallel" (v7x dual-TC friendly).
    out_ref[...] = _row_nll(pred_ref[...], tgt_ref[...], from_logits)


def _mse_kernel(trans_ref, out_ref, *, scaled_alpha):
    t = trans_ref[...].astype(jnp.float32)
    out_ref[0, 0] = jnp.sum(t * t) * jnp.float32(scaled_alpha)


# ---------------------------------------------------------------------------
# Wrapper
# ---------------------------------------------------------------------------

def get_loss(pred, target, trans_feat=None, alpha=0.1, *,
             from_logits=False, use_grid=None, tile_rows=None):
    """Pallas equivalent of GetLoss.forward.

    pred:        (N, C) log-probabilities (or raw logits if from_logits=True)
    target:      (N,)   integer class indices
    trans_feat:  optional (B, K, K) float transform features
    """
    n, c = pred.shape
    target2d = target.astype(jnp.int32).reshape(n, 1)
    inv_n = 1.0 / float(n)

    vmem = pltpu.MemorySpace.VMEM
    smem = pltpu.MemorySpace.SMEM
    scalar_out = jax.ShapeDtypeStruct((1, 1), jnp.float32)
    itemsize = pred.dtype.itemsize
    pred_bytes = pred.size * itemsize

    trans2d = None
    scaled_alpha = 0.0
    if trans_feat is not None:
        trans2d = trans_feat.reshape(1, -1)                 # lane-dense (1, B*K*K)
        scaled_alpha = float(alpha) / float(trans2d.size)

    if use_grid is None:
        use_grid = pred_bytes > _SMALL_PATH_PRED_BYTES

    trans_ewise = 0 if trans2d is None else 2 * trans2d.size
    nll_flops = (8 if from_logits else 3) * pred.size
    transc = pred.size if from_logits else 0

    if not use_grid:
        # ----------------- fused single-block path (tiny shapes) -----------
        ce = pl.CostEstimate(
            flops=nll_flops + trans_ewise, transcendentals=transc,
            bytes_accessed=pred_bytes + 4 * n
            + (0 if trans2d is None else trans2d.size * trans2d.dtype.itemsize)
            + 4)
        if trans_feat is None:
            out = pl.pallas_call(
                functools.partial(_small_nll_kernel, inv_n=inv_n,
                                  from_logits=from_logits),
                out_shape=scalar_out,
                in_specs=[pl.BlockSpec(memory_space=vmem),
                          pl.BlockSpec(memory_space=vmem)],
                out_specs=pl.BlockSpec(memory_space=smem),
                cost_estimate=ce,
            )(pred, target2d)
        else:
            out = pl.pallas_call(
                functools.partial(_small_nll_mse_kernel, inv_n=inv_n,
                                  scaled_alpha=scaled_alpha,
                                  from_logits=from_logits),
                out_shape=scalar_out,
                in_specs=[pl.BlockSpec(memory_space=vmem),
                          pl.BlockSpec(memory_space=vmem),
                          pl.BlockSpec(memory_space=vmem)],
                out_specs=pl.BlockSpec(memory_space=smem),
                cost_estimate=ce,
            )(pred, target2d, trans2d)
        return out[0, 0]

    # --------------------- gridded large-N path ----------------------------
    if tile_rows is not None:
        tile_n = max(8, _round_up(int(tile_rows), 8))
    else:
        tile_n = _TILE_PRED_BYTES // max(1, c * itemsize)
        tile_n = max(8, (tile_n // 8) * 8)
    tile_n = min(tile_n, 1024, _round_up(n, 8))
    grid = (pl.cdiv(n, tile_n),)

    per_row = pl.pallas_call(
        functools.partial(_tiled_nll_kernel, from_logits=from_logits),
        out_shape=jax.ShapeDtypeStruct((n, 1), jnp.float32),
        grid=grid,
        in_specs=[pl.BlockSpec((tile_n, c), lambda i: (i, 0)),
                  pl.BlockSpec((tile_n, 1), lambda i: (i, 0))],
        out_specs=pl.BlockSpec((tile_n, 1), lambda i: (i, 0)),
        compiler_params=pltpu.CompilerParams(
            dimension_semantics=("parallel",),
            vmem_limit_bytes=32 * 1024 * 1024),
        cost_estimate=pl.CostEstimate(
            flops=nll_flops, transcendentals=transc,
            bytes_accessed=pred_bytes + 8 * n),
    )(pred, target2d)

    loss = jnp.sum(per_row) * jnp.float32(inv_n)

    if trans_feat is not None:
        mse = pl.pallas_call(
            functools.partial(_mse_kernel, scaled_alpha=scaled_alpha),
            out_shape=scalar_out,
            in_specs=[pl.BlockSpec(memory_space=vmem)],
            out_specs=pl.BlockSpec(memory_space=smem),
            cost_estimate=pl.CostEstimate(
                flops=trans_ewise, transcendentals=0,
                bytes_accessed=trans2d.size * trans2d.dtype.itemsize + 4),
        )(trans2d)
        loss = loss + mse[0, 0]

    return loss


# ---------------------------------------------------------------------------
# Pure-JAX reference (mirrors F.nll_loss + F.mse_loss)
# ---------------------------------------------------------------------------

def _reference(pred, target, trans_feat, alpha, from_logits=False):
    logp = jax.nn.log_softmax(pred.astype(jnp.float32), axis=-1) \
        if from_logits else pred.astype(jnp.float32)
    picked = jnp.take_along_axis(
        logp, target[:, None].astype(jnp.int32), axis=1)
    loss = -jnp.mean(picked)
    if trans_feat is not None:
        loss = loss + alpha * jnp.mean(trans_feat.astype(jnp.float32) ** 2)
    return loss


if __name__ == "__main__":
    key = jax.random.PRNGKey(0)
    k1, k2, k3, k4, k5 = jax.random.split(key, 5)
    alpha = 0.1

    # --- Small fused path: batch 8, 40 classes, 3x3 feature transforms -----
    N, C = 8, 40
    B, K = 8, 3
    logits = jax.random.normal(k1, (N, C), dtype=jnp.float32)
    pred = jax.nn.log_softmax(logits, axis=-1)
    target = jax.random.randint(k2, (N,), 0, C, dtype=jnp.int32)
    trans_feat = jax.random.normal(k3, (B, K, K), dtype=jnp.float32)

    loss = get_loss(pred, target, trans_feat, alpha=alpha)
    jax.block_until_ready(loss)
    ref = _reference(pred, target, trans_feat, alpha)
    assert jnp.allclose(loss, ref, atol=1e-5, rtol=1e-4), (loss, ref)

    loss_no_tf = get_loss(pred, target, None, alpha=alpha)
    jax.block_until_ready(loss_no_tf)
    ref_no_tf = _reference(pred, target, None, alpha)
    assert jnp.allclose(loss_no_tf, ref_no_tf, atol=1e-5, rtol=1e-4), (
        loss_no_tf, ref_no_tf)

    # Fused log_softmax + NLL from raw logits (review item #1).
    loss_fused = get_loss(logits, target, trans_feat, alpha=alpha,
                          from_logits=True)
    jax.block_until_ready(loss_fused)
    ref_fused = _reference(logits, target, trans_feat, alpha, from_logits=True)
    assert jnp.allclose(loss_fused, ref_fused, atol=1e-5, rtol=1e-4), (
        loss_fused, ref_fused)

    # --- Gridded ("parallel" row axis) path, forced at a modest size -------
    Ng, Cg = 512, 40
    logits_g = jax.random.normal(k4, (Ng, Cg), dtype=jnp.float32)
    pred_g = jax.nn.log_softmax(logits_g, axis=-1)
    target_g = jax.random.randint(k5, (Ng,), 0, Cg, dtype=jnp.int32)

    loss_g = get_loss(pred_g, target_g, trans_feat, alpha=alpha,
                      use_grid=True, tile_rows=128)
    jax.block_until_ready(loss_g)
    ref_g = _reference(pred_g, target_g, trans_feat, alpha)
    assert jnp.allclose(loss_g, ref_g, atol=1e-5, rtol=1e-4), (loss_g, ref_g)

    loss_g_fused = get_loss(logits_g, target_g, None, alpha=alpha,
                            from_logits=True, use_grid=True, tile_rows=128)
    jax.block_until_ready(loss_g_fused)
    ref_g_fused = _reference(logits_g, target_g, None, alpha, from_logits=True)
    assert jnp.allclose(loss_g_fused, ref_g_fused, atol=1e-5, rtol=1e-4), (
        loss_g_fused, ref_g_fused)

    print("KERNEL_OK")
</pallas_src>

<mosaic_0001>
module attributes {stable_mosaic.version = 11 : i64} {
  func.func @_small_nll_mse_kernel(%arg0: memref<8x40xf32, #tpu.memory_space<vmem>>, %arg1: memref<8x1xi32, #tpu.memory_space<vmem>>, %arg2: memref<1x72xf32, #tpu.memory_space<vmem>>, %arg3: memref<1x1xf32, #tpu.memory_space<smem>>) attributes {dimension_semantics = [], scalar_prefetch = 0 : i64, scratch_operands = 0 : i64, tpu.core_type = #tpu.core_type<tc>} {
    %c0 = arith.constant 0 : index
    %c0_0 = arith.constant 0 : index
    %0 = vector.load %arg0[%c0, %c0_0] : memref<8x40xf32, #tpu.memory_space<vmem>>, vector<8x40xf32>
    %c0_1 = arith.constant 0 : index
    %c0_2 = arith.constant 0 : index
    %1 = vector.load %arg1[%c0_1, %c0_2] : memref<8x1xi32, #tpu.memory_space<vmem>>, vector<8x1xi32>
    %2 = tpu.iota {dimensions = array<i32: 1>} : vector<8x40xi32>
    %3 = vector.broadcast %1 : vector<8x1xi32> to vector<8x40xi32>
    %4 = arith.cmpi eq, %2, %3 : vector<8x40xi32>
    %c0_i32 = arith.constant 0 : i32
    %5 = arith.sitofp %c0_i32 : i32 to f32
    %6 = vector.broadcast %5 : f32 to vector<8x40xf32>
    %7 = arith.select %4, %0, %6 : vector<8x40xi1>, vector<8x40xf32>
    %cst = arith.constant dense<0.000000e+00> : vector<8xf32>
    %8 = vector.multi_reduction <add>, %7, %cst [1] : vector<8x40xf32> to vector<8xf32>
    %9 = vector.shape_cast %8 : vector<8xf32> to vector<8x1xf32>
    %cst_3 = arith.constant 0.000000e+00 : f32
    %10 = vector.broadcast %cst_3 : f32 to vector<8x1xf32>
    %11 = arith.subf %10, %9 : vector<8x1xf32>
    %c0_4 = arith.constant 0 : index
    %c0_5 = arith.constant 0 : index
    %12 = vector.load %arg2[%c0_4, %c0_5] : memref<1x72xf32, #tpu.memory_space<vmem>>, vector<1x72xf32>
    %13 = vector.shape_cast %11 : vector<8x1xf32> to vector<1x8x1xf32>
    %cst_6 = arith.constant dense<0.000000e+00> : vector<1xf32>
    %14 = vector.multi_reduction <add>, %13, %cst_6 [1, 2] : vector<1x8x1xf32> to vector<1xf32>
    %15 = vector.shape_cast %14 : vector<1xf32> to vector<1x1x1xf32>
    %16 = vector.extract %15[0, 0, 0] : f32 from vector<1x1x1xf32>
    %cst_7 = arith.constant 1.250000e-01 : f32
    %17 = arith.mulf %16, %cst_7 : f32
    %18 = arith.mulf %12, %12 : vector<1x72xf32>
    %19 = vector.shape_cast %18 : vector<1x72xf32> to vector<1x1x72xf32>
    %cst_8 = arith.constant dense<0.000000e+00> : vector<1xf32>
    %20 = vector.multi_reduction <add>, %19, %cst_8 [1, 2] : vector<1x1x72xf32> to vector<1xf32>
    %21 = vector.shape_cast %20 : vector<1xf32> to vector<1x1x1xf32>
    %22 = vector.extract %21[0, 0, 0] : f32 from vector<1x1x1xf32>
    %cst_9 = arith.constant 0.00138888892 : f32
    %23 = arith.mulf %22, %cst_9 : f32
    %24 = arith.addf %17, %23 : f32
    %c0_10 = arith.constant 0 : index
    %c0_11 = arith.constant 0 : index
    %25 = memref.load %arg3[%c0_10, %c0_11] : memref<1x1xf32, #tpu.memory_space<smem>>
    memref.store %24, %arg3[%c0_10, %c0_11] : memref<1x1xf32, #tpu.memory_space<smem>>
    return
  }
}

</mosaic_0001>

<bundles_post_ra>
// kernel: tpu_custom_call.1
= control target key start
LH: loop header
LB: loop body
LE: loop exit
PB: predicated region body
PF: predicated region fallthrough
CT: control target
= control target key end

     0   :  { %s128_s0 = inlined_call_operand.vmem [shape: f32[8,40], index: 0, kind: input, shape index: {}]   ;;  %s129_s1 = inlined_call_operand.vmem [shape: s32[8,1], index: 1, kind: input, shape index: {}]   ;;  %s130_s2 = inlined_call_operand.vmem [shape: f32[1,72], index: 2, kind: input, shape index: {}]   ;;  %s131_s3 = inlined_call_operand.hbm [shape: f32[1,1], index: 3, kind: output, shape index: {}]  }
   0x1   :  { %v16_v0 = vld [vmem:[%s129_s1] sm:$0xff] }
   0x2   :  { %8 = vsyncpa [#allocation3], 0  ;;  %v94_v1 = vmov 0   ;;  %v17_v2 = vlaneseq  ;;  %v15_v4 = vld [vmem:[%s128_s0] sm:$0xff]  ;;  %vm24_vm0 = vcmask 326656   ;;  %vm30_vm2 = vcmask 7168  }
   0x3   :  { %79 = vset.pattern.permute.xlu0 %v94_v1  ;;  %v29_v10 = vld [vmem:[%s130_s2] sm:$0x1]  ;;  %vm43_vm3 = vcmask 581632   ;;  %s63_s18 = sshll.u32 %s131_s3, 4  ;;  %s95_s23 = smov [#allocation2]   ;;  %s64_s18 = int_to_ptr.hbm [resolvable:$true] %s63_s18 }
   0x4   :  { %20 = vperm.xlu0 %79, %v16_v0   ;;  %v18_v3 = vand.u32 127, %v17_v2  ;;  %v42_v12 = vmul.f32 %v29_v10, %v29_v10 }
   0x6   :  { %v44_v13 = vsel %vm43_vm3, %v42_v12, 0.0 }
  0x76   :  { %v21_v5 = vpop.permute.xlu0 %20 }
  0x77   :  { %vm22_vm1 = vcmp.eq.s32.totalorder %v18_v3, %v21_v5 }
  0x78   :  { %v23_v6 = vsel %vm22_vm1, %v15_v4, 0.0 }
  0x79   :  { %v25_v7 = vsel %vm24_vm0, %v23_v6, 0.0 }
  0x7a   :  { %26 = vadd.xlane.f32.xlu0 %v25_v7 }
  0xed   :  { %v27_v8 = vpop.xlane.xlu0 %26 }
  0xee   :  { %v28_v9 = vsub.f32 0.0, %v27_v8 }
  0xf0   :  { %v31_v11 = vsel %vm30_vm2, %v28_v9, 0.0 }
  0xf1   :  { %32 = vadd.xlane.f32.xlu1 %v31_v11 }
  0xf9   :  { %45 = vadd.xlane.f32.xlu1 %v44_v13 }
 0x164   :  { %v33_v14 = vpop.xlane.xlu1 %32 }
 0x165   :  { %v34_v15 = vrot.slane %v33_v14, 4 }
 0x167   :  { %v35_v16 = vadd.f32 %v34_v15, %v33_v14 }
 0x169   :  { %v36_v17 = vrot.slane %v35_v16, 2 }
 0x16b   :  { %v37_v18 = vadd.f32 %v36_v17, %v35_v16 }
 0x16c   :  { %v46_v19 = vpop.xlane.xlu1 %45 }
 0x16d   :  { %v47_v20 = vrot.slane %v46_v19, 4  ;;  %v38_v21 = vrot.slane %v37_v18, 1 }
 0x16f   :  { %v48_v22 = vadd.f32 %v47_v20, %v46_v19  ;;  %v39_v23 = vadd.f32 %v38_v21, %v37_v18 }
 0x171   :  { %v49_v24 = vrot.slane %v48_v22, 2  ;;  %73 = vpush %v39_v23 }
 0x173   :  { %v50_v25 = vadd.f32 %v49_v24, %v48_v22 }
 0x175   :  { %v51_v26 = vrot.slane %v50_v25, 1 }
 0x177   :  { %v52_v27 = vadd.f32 %v51_v26, %v50_v25 }
 0x179   :  { %75 = vpush %v52_v27 }
 0x1a2   :  { %s74_s0 = spop %73 }
 0x1a3   :  { %s41_s19 = smul.f32 0.125, %s74_s0 }
 0x1aa   :  { %s76_s20 = spop %75 }
 0x1ab   :  { %s54_s21 = smul.f32 0.0013888889, %s76_s20 }
 0x1ad   :  { %s55_s22 = sadd.f32 %s54_s21, %s41_s19 }
 0x1af   :  { %57 = sst [smem:[#allocation2]] %s55_s22 }
 0x1b0   :  { %66 = dma.smem_to_hbm %s95_s23, 16, %s64_s18, [#allocation3]  }
 0x1b1   :  { %92 = dma.done.wait [#allocation3], 16  }
 0x1b2   :  { %93 = vsyncadd [#allocation3], 4294967280 }
 0x1b3   :  { %71 = sfence }
 0x1b4   :  { %72 = vsyncpa [#allocation3], 1 }

</bundles_post_ra>
